<compile_context>
chip_gen: v6e
topology: v6e:2x2x1
jax: 0.10.0
libtpu: 0.0.40
codegen_flags: <defaults>
</compile_context>

<pallas_src>
import math

import jax
import jax.numpy as jnp
from jax import lax
from jax.experimental import pallas as pl
from jax.experimental.pallas import tpu as pltpu

NUM_READ_CLASSES = 4                                  # read bases A/C/G/T
NUM_REF_CLASSES = 5                                   # ref bases  A/C/G/T/N
NUM_FUSED = NUM_READ_CLASSES * NUM_REF_CLASSES        # 20 (read, ref) combos
_K_MAX = 16                                           # max row-packing factor
_VMEM_BUDGET = 8 * 1024 * 1024                        # conservative working-set cap


def _seq_embed_kernel(idx_ref, w_ref, out_ref):
    """One grid step: (G, k) fused indices -> (G, k*ws) packed embedding rows.

    idx_ref: (G, k) int32, value = slot*20 + base*5 + ref (disjoint ranges per slot)
    w_ref:   (20*k, W) f32 block-diagonal fused table (resident across steps)
    out_ref: (G, W) f32, W multiple of 128 -> lane-dense unmasked stores
    """
    g, k = idx_ref.shape
    ncol = w_ref.shape[0]
    col = lax.broadcasted_iota(jnp.int32, (g, ncol), 1)
    hot = idx_ref[:, 0:1] == col
    for p in range(1, k):                              # k is small & static (<= 16)
        hot = hot | (idx_ref[:, p:p + 1] == col)
    oh = hot.astype(jnp.float32)                       # (G, 20k) fused one-hot
    # Single MXU pass yields the concatenated (read | ref) embeddings for all k
    # packed slots of every output sublane; one full-width store.
    out_ref[...] = jnp.dot(oh, w_ref[...], preferred_element_type=jnp.float32)


def seq_embed(batch_base_seq, batch_ref_seq, w_read, w_ref, *, target_rows=2048):
    """Pallas implementation of SeqEmbed.forward (learnable, include_ref=True).

    batch_base_seq: [B, S] int in [0, 4)
    batch_ref_seq:  [B, S] int in [0, 5)
    w_read: [4, E] f32, w_ref: [5, E] f32
    returns: [B, S, 2*E] f32  (read embedding first, ref embedding second)
    """
    B, S = batch_base_seq.shape
    E = w_read.shape[1]
    out_w = 2 * E
    N = B * S

    # --- row-packing factor: pack k consecutive rows into one lane-dense output
    #     row of width k*2E (multiple of 128) -> zero store padding.
    if out_w % 128 == 0:
        k, ws = 1, out_w                               # already lane-dense
    else:
        k0 = 128 // math.gcd(out_w, 128)
        if k0 <= _K_MAX:
            k, ws = k0, out_w                          # exact packing, no padding
        else:
            k, ws = 1, ((out_w + 127) // 128) * 128    # fallback: lane-pad + slice
    W = k * ws                                         # physical lane width (%128==0)

    # --- grid: G groups (= G*k logical rows) per step, sized to stay inside VMEM
    #     (idx buffer is lane-padded to 128, output buffer is G*W f32, both x2).
    n_groups = -(-N // k)
    G = min(((-(-min(target_rows, N) // k) + 7) // 8) * 8,
            ((n_groups + 7) // 8) * 8)
    G = max(G, 8)
    while G > 8 and 2 * 4 * G * (128 + W) > _VMEM_BUDGET:
        G = max(8, (G // 2 // 8) * 8)
    num_steps = -(-n_groups // G)
    n_groups_pad = num_steps * G
    n_pad = n_groups_pad * k

    # --- fused per-row index stream: slot*20 + base*5 + ref (single int32 per row).
    base = batch_base_seq.reshape(N).astype(jnp.int32)
    refs = batch_ref_seq.reshape(N).astype(jnp.int32)
    fused = base * NUM_REF_CLASSES + refs              # (N,) in [0, 20)
    if n_pad > N:
        fused = jnp.pad(fused, (0, n_pad - N))         # pad rows -> combo 0 (sliced off)
    idx2d = (fused.reshape(n_groups_pad, k)
             + (jnp.arange(k, dtype=jnp.int32) * NUM_FUSED)[None, :])

    # --- fused table: row b*5+r = [w_read[b] | w_ref[r]]; kron(I_k, .) makes it
    #     block-diagonal so slot p lands in lanes [p*ws, p*ws + 2E).
    w_fused = jnp.concatenate(
        [jnp.repeat(w_read.astype(jnp.float32), NUM_REF_CLASSES, axis=0),
         jnp.tile(w_ref.astype(jnp.float32), (NUM_READ_CLASSES, 1))], axis=1)
    if ws > out_w:
        w_fused = jnp.pad(w_fused, ((0, 0), (0, ws - out_w)))
    w_tab = jnp.kron(jnp.eye(k, dtype=jnp.float32), w_fused) if k > 1 else w_fused

    out = pl.pallas_call(
        _seq_embed_kernel,
        out_shape=jax.ShapeDtypeStruct((n_groups_pad, W), jnp.float32),
        grid_spec=pltpu.PrefetchScalarGridSpec(
            num_scalar_prefetch=0,
            grid=(num_steps,),
            in_specs=[
                pl.BlockSpec((G, k), lambda i: (i, 0)),
                pl.BlockSpec((NUM_FUSED * k, W), lambda i: (0, 0)),  # resident table
            ],
            out_specs=pl.BlockSpec((G, W), lambda i: (i, 0)),
        ),
        compiler_params=pltpu.CompilerParams(
            dimension_semantics=("parallel",)),
    )(idx2d, w_tab)

    # Unpack: contiguous reshape (free), drop padded rows / lanes.
    out = out.reshape(n_groups_pad * k, ws)[:N, :out_w]
    return out.reshape(B, S, out_w)


if __name__ == "__main__":
    key = jax.random.PRNGKey(0)

    def reference(base, refs, w_r, w_f):
        # Pure-JAX reference (torch: cat(read_emb(base), ref_emb(ref), dim=2)).
        return jnp.concatenate([jnp.take(w_r, base, axis=0),
                                jnp.take(w_f, refs, axis=0)], axis=2)

    # Configs exercise: packed path (2E=64 -> k=2), lane-exact path (2E=128 -> k=1),
    # and lane-pad fallback (2E=14).
    for (B, S, E) in [(2, 8, 32), (2, 8, 64), (2, 8, 7)]:
        k1, k2, k3, k4, key = jax.random.split(key, 5)
        w_read = jax.random.normal(k3, (NUM_READ_CLASSES, E), jnp.float32)
        w_ref = jax.random.normal(k4, (NUM_REF_CLASSES, E), jnp.float32)
        batch_base_seq = jax.random.randint(k1, (B, S), 0, NUM_READ_CLASSES,
                                            dtype=jnp.int32)
        batch_ref_seq = jax.random.randint(k2, (B, S), 0, NUM_REF_CLASSES,
                                           dtype=jnp.int32)

        out = jax.block_until_ready(
            seq_embed(batch_base_seq, batch_ref_seq, w_read, w_ref))
        expect = reference(batch_base_seq, batch_ref_seq, w_read, w_ref)

        assert out.shape == (B, S, 2 * E), out.shape
        assert jnp.allclose(out, expect, atol=1e-6), f"mismatch vs reference (E={E})"

    print("KERNEL_OK")
</pallas_src>

<mosaic_0001>
module attributes {stable_mosaic.version = 11 : i64} {
  func.func @_seq_embed_kernel(%arg0: i32, %arg1: memref<8x2xi32, #tpu.memory_space<vmem>>, %arg2: memref<40x128xf32, #tpu.memory_space<vmem>>, %arg3: memref<8x128xf32, #tpu.memory_space<vmem>>) attributes {dimension_semantics = [#tpu.dimension_semantics<parallel>], iteration_bounds = array<i64: 1>, scalar_prefetch = 0 : i64, scratch_operands = 0 : i64, tpu.core_type = #tpu.core_type<tc>, window_params = [{transform_indices = @transform_0, window_bounds = array<i64: 8, 2>}, {pipeline_mode = #tpu.pipeline_mode<synchronous>, transform_indices = @transform_1, window_bounds = array<i64: 40, 128>}, {transform_indices = @transform_2, window_bounds = array<i64: 8, 128>}]} {
    %0 = tpu.iota {dimensions = array<i32: 1>} : vector<8x40xi32>
    %c0 = arith.constant 0 : index
    %c0_0 = arith.constant 0 : index
    %1 = vector.load %arg1[%c0, %c0_0] : memref<8x2xi32, #tpu.memory_space<vmem>>, vector<8x1xi32>
    %2 = vector.broadcast %1 : vector<8x1xi32> to vector<8x40xi32>
    %3 = arith.cmpi eq, %2, %0 : vector<8x40xi32>
    %c0_1 = arith.constant 0 : index
    %c1 = arith.constant 1 : index
    %4 = vector.load %arg1[%c0_1, %c1] : memref<8x2xi32, #tpu.memory_space<vmem>>, vector<8x1xi32>
    %5 = vector.broadcast %4 : vector<8x1xi32> to vector<8x40xi32>
    %6 = arith.cmpi eq, %5, %0 : vector<8x40xi32>
    %7 = arith.ori %3, %6 : vector<8x40xi1>
    %8 = arith.extui %7 : vector<8x40xi1> to vector<8x40xi32>
    %9 = arith.sitofp %8 : vector<8x40xi32> to vector<8x40xf32>
    %c0_2 = arith.constant 0 : index
    %c0_3 = arith.constant 0 : index
    %10 = vector.load %arg2[%c0_2, %c0_3] : memref<40x128xf32, #tpu.memory_space<vmem>>, vector<40x128xf32>
    %cst = arith.constant dense<0.000000e+00> : vector<8x128xf32>
    %11 = tpu.matmul %9, %10, %cst {dimension_numbers = #tpu.dot_dimension_numbers<[1], [0], [0], [1], [0, 0, 1, 1], [], []>} : vector<8x40xf32>, vector<40x128xf32>, vector<8x128xf32> -> vector<8x128xf32>
    %c0_4 = arith.constant 0 : index
    %c0_5 = arith.constant 0 : index
    %12 = vector.load %arg3[%c0_4, %c0_5] : memref<8x128xf32, #tpu.memory_space<vmem>>, vector<8x128xf32>
    tpu.vector_store %arg3[%c0_4, %c0_5], %11 {strides = array<i32>} : memref<8x128xf32, #tpu.memory_space<vmem>>, vector<8x128xf32>,
    return
  }
  func.func @transform_0(%arg0: i32) -> (i32, i32) {
    %c0_i32 = arith.constant 0 : i32
    %c0_i32_0 = arith.constant 0 : i32
    return %arg0, %c0_i32 : i32, i32
  }
  func.func @transform_1(%arg0: i32) -> (i32, i32) {
    %c0_i32 = arith.constant 0 : i32
    %c0_i32_0 = arith.constant 0 : i32
    %c0_i32_1 = arith.constant 0 : i32
    return %c0_i32, %c0_i32_0 : i32, i32
  }
  func.func @transform_2(%arg0: i32) -> (i32, i32) {
    %c0_i32 = arith.constant 0 : i32
    %c0_i32_0 = arith.constant 0 : i32
    return %arg0, %c0_i32 : i32, i32
  }
}

</mosaic_0001>

<bundles_post_ra>
// kernel: tpu_custom_call.1
= control target key start
LH: loop header
LB: loop body
LE: loop exit
PB: predicated region body
PF: predicated region fallthrough
CT: control target
= control target key end

     0   :  { %7 = vsyncpa [#allocation3], 0  ;;  %s242_s0 = inlined_call_operand.vmem [shape: s32[8,2], index: 0, kind: input, shape index: {}]   ;;  %s243_s1 = inlined_call_operand.hbm [shape: f32[40,128], index: 1, kind: input, shape index: {}]   ;;  %s244_s2 = inlined_call_operand.hbm [shape: f32[8,128], index: 2, kind: output, shape index: {}]  }
   0x1   :  { %8 = vsyncpa [#allocation4], 0  ;;  %s210_s9 = smov [#allocation2]  }
   0x2   :  { %s16_s10 = sshll.u32 %s210_s9, 4  ;;  %s17_s10 = int_to_ptr.vmem [resolvable:$true] %s16_s10 }
   0x3   :  { %s174_s11 = scalar_lea.vmem %s17_s10, 640  ;;  %p179_p1 = scmp.lt.s32.totalorder %s17_s10, %s17_s10 }
   0x4   :  { %p175_p0 = scmp.ne.s32.totalorder %s17_s10, %s174_s11  ;;  %p180_p2 = scmp.lt.s32.totalorder %s174_s11, %s174_s11 }
   0x6   :  { %p181_p3 = por %p180_p2, %p179_p1 }
   0x8   :  { %p182_p4 = pnand %p181_p3, %p175_p0 }
   0xa   :  { %185 = shalt.err (!%p182_p4)
}
   0xb   :  { %s211_s12 = smov 128   ;;  %s212_s13 = smov 8  }
   0xc   :  { %22 = dma.hbm_to_vmem [thread:$0]  %s243_s1, 640, %s17_s10, [#allocation3], %s211_s12, %s211_s12, %s212_s13  }
   0xd   :  { %206 = dma.done.wait [#allocation3], 640  }
   0xe   :  { %207 = vsyncadd [#allocation3], 4294966656  ;;  %v213_v0 = vmov 0   ;;  %v214_v1 = vmov 0.0   ;;  %v28_v2 = vld [vmem:[%s242_s0] sm:$0xff]  ;;  %v43_v4 = vld [vmem:[#allocation2 + $0x18] sm:$0xff]  ;;  %v26_v9 = vlaneseq }
   0xf   :  { %164 = vset.pattern.permute.xlu0 %v213_v0  ;;  %143 = vmatprep.subr.mxu0 %v214_v1  ;;  %v44_v3 = vld [vmem:[#allocation2 + $0x20] sm:$0xff]  ;;  %v42_v5 = vld [vmem:[#allocation2 + $0x10] sm:$0xff]  ;;  %v41_v6 = vld [vmem:[#allocation2 + $0x8] sm:$0xff]  ;;  %vm215_vm0 = vmmov 0   ;;  %v216_v7 = vmov 1   ;;  %vm45_vm3 = vcmask 326656  }
  0x10   :  { %30 = vperm.xlu0 %164, %v28_v2   ;;  %144 = vmatpush3.msra.mxu0 %v44_v3  ;;  %v40_v8 = vld [vmem:[#allocation2] sm:$0xff]  ;;  %v27_v11 = vand.u32 127, %v26_v9  ;;  %s217_s0 = smov [#allocation5]  }
  0x11   :  { %145 = vmatprep.subr.mxu0 %v214_v1  ;;  %153 = vmatprep.mubr.msk.f32.mxu0 %vm215_vm0, %v214_v1  ;;  %s126_s1 = sshll.u32 %s217_s0, 4  ;;  %s127_s1 = int_to_ptr.vmem [resolvable:$true] %s126_s1 }
  0x12   :  { %146 = vmatpush3.msra.mxu0 %v43_v4  ;;  %s186_s18 = scalar_lea.vmem %s127_s1, 128  ;;  %p191_p6 = scmp.lt.s32.totalorder %s127_s1, %s127_s1 }
  0x13   :  { %147 = vmatprep.subr.mxu0 %v214_v1  ;;  %p187_p5 = scmp.ne.s32.totalorder %s127_s1, %s186_s18  ;;  %p192_p7 = scmp.lt.s32.totalorder %s186_s18, %s186_s18 }
  0x14   :  { %165 = vset.pattern.permute.xlu0 %v216_v7  ;;  %148 = vmatpush3.msra.mxu0 %v42_v5 }
  0x15   :  { %34 = vperm.xlu0 %165, %v28_v2   ;;  %149 = vmatprep.subr.mxu0 %v214_v1  ;;  %p193_p8 = por %p192_p7, %p191_p6 }
  0x16   :  { %150 = vmatpush3.msra.mxu0 %v41_v6 }
  0x17   :  { %151 = vmatprep.subr.mxu0 %v214_v1  ;;  %p194_p9 = pnand %p193_p8, %p187_p5 }
  0x18   :  { %152 = vmatpush3.msra.mxu0 %v40_v8 }
  0x8b   :  { %v31_v10 = vpop.permute.xlu0 %30 }
  0x8c   :  { %vm32_vm1 = vcmp.eq.s32.totalorder %v31_v10, %v27_v11 }
  0x90   :  { %v35_v12 = vpop.permute.xlu0 %34 }
  0x91   :  { %vm36_vm2 = vcmp.eq.s32.totalorder %v35_v12, %v27_v11 }
  0x92   :  { %vm37_vm4 = vmor %vm32_vm1, %vm36_vm2 }
  0x93   :  { %v135_v13 = vsel %vm37_vm4, 1.0, %v214_v1 }
  0x94   :  { %154 = vmatmul.mubr.msk.f32.vlgmr.msra.gmra.mxu0 %vm45_vm3, %v135_v13 }
 0x154   :  { %v115_v14 = vpop.f32.mrf.mxu0 }
 0x155   :  { %119 = vst [vmem:[#allocation5] sm:$0xff] %v115_v14 }
 0x156   :  { %v155_v15 = vpop.f32.mrf.mxu0 }
 0x157   :  { %197 = shalt.err (!%p194_p9)
}
 0x158   :  { %129 = dma.vmem_to_hbm [thread:$0]  %s127_s1, 128, %s244_s2, [#allocation4]  }
 0x159   :  { %208 = dma.done.wait [#allocation4], 128  }
 0x15a   :  { %209 = vsyncadd [#allocation4], 4294967168 }
 0x15b   :  { %133 = vsyncpa [#allocation3], 1 }
 0x15c   :  { %134 = vsyncpa [#allocation4], 1 }

</bundles_post_ra>
